<compile_context>
chip_gen: v5e
topology: v5e:2x2
jax: 0.10.0
libtpu: 0.0.40
codegen_flags: <defaults>
</compile_context>

<pallas_src>
import functools

import jax
import jax.numpy as jnp
import numpy as np
from jax.experimental import pallas as pl
from jax.experimental.pallas import tpu as pltpu


def _round_up(x: int, m: int) -> int:
    return ((x + m - 1) // m) * m


# --------------------------------------------------------------------------- #
# Kernel
# --------------------------------------------------------------------------- #
def _mixing_kernel(x_ref, w0e_ref, b0_ref, w1_ref, b1_ref, r_ref, out_ref, *,
                   hidden_dim, k4, ah_pad, seg):
    H = hidden_dim
    x = x_ref[...]                                    # [BB, F]  = [states | q | 0]
    bb = x.shape[0]

    # ---- fused layer-0 of all 4 hyper-nets + q-expansion: ONE MXU dot --------
    x1 = jnp.dot(x, w0e_ref[...], preferred_element_type=jnp.float32)   # [BB, k4+AH]
    h0 = jnp.maximum(x1[:, :k4] + b0_ref[...], 0.0)   # ReLU hidden of the 4 nets
    q_expand = x1[:, k4:]                             # [BB, AH]: lane a*H+h == q[:, a]

    # ---- fused (block-diagonal) layer-1: ONE MXU dot --------------------------
    # z columns (all segments 128-aligned):
    #   [0, A*H)          : hyper_w1 output
    #   [AH, AH+H)        : hyper_b1 output,  lane AH+H == 1.0 (packed const)
    #   [AH+SEG, +H)      : hyper_w2 output,  lane AH+SEG+H == hyper_b2 output
    z = jnp.dot(h0, w1_ref[...], preferred_element_type=jnp.float32) + b1_ref[...]
    c_b1 = ah_pad
    c_w2 = ah_pad + seg

    # ---- mixing: mix[b,h] = sum_a q[b,a] * |w1[b,a,h]| + b1[b,h] --------------
    p = q_expand * jnp.abs(z[:, :ah_pad])             # [BB, AH]   (VPU)
    mix = jnp.dot(p, r_ref[...], preferred_element_type=jnp.float32) \
        + z[:, c_b1:c_b1 + seg]                       # agent-sum on MXU (R is 0/1)
    # lane H of mix is exactly 1.0 (packed bias), lanes > H are exactly 0, so after
    # ELU: hidden[:, H] == 1 (carries b2 through the product), hidden[:, >H] == 0.
    hidden = jnp.where(mix > 0, mix, jnp.exp(jnp.minimum(mix, 0.0)) - 1.0)   # ELU(1)

    # ---- final reduce fused into ONE K=128 dot over an aligned tile -----------
    # prod lanes [0,H) = hidden*|w2|, lane H = 1*b2 (raw, no abs), lanes > H = 0.
    w2b2 = z[:, c_w2:c_w2 + seg]                      # aligned 128-lane view
    lane = jax.lax.broadcasted_iota(jnp.int32, (1, seg), 1)
    w2proc = jnp.where(lane < H, jnp.abs(w2b2), w2b2)
    prod = hidden * w2proc                            # [BB, SEG]
    q_row = jax.lax.dot_general(                      # (1,SEG) x (BB,SEG)^T -> (1,BB)
        jnp.ones((1, seg), jnp.float32), prod,
        (((1,), (1,)), ((), ())), preferred_element_type=jnp.float32)

    out_ref[...] = q_row.reshape(1, 1, bb)            # lane-dense row store


# --------------------------------------------------------------------------- #
# Host-side weight packing (numpy; done once)
# --------------------------------------------------------------------------- #
def pack_params(params, num_agents, state_size, hidden_dim):
    (hw1_w0, hw1_b0, hw1_w1, hw1_b1,
     hb1_w0, hb1_b0, hb1_w1, hb1_b1,
     hw2_w0, hw2_b0, hw2_w1, hw2_b1,
     hb2_w0, hb2_b0, hb2_w1, hb2_b1) = params
    A, S, H = num_agents, state_size, hidden_dim

    F = _round_up(S + A, 8)            # fused input width [states | q | pad]
    K4 = _round_up(4 * H, 128)         # fused layer-0 hidden width (4 hyper-nets)
    AH = _round_up(A * H, 128)         # aligned w1 segment
    SEG = _round_up(H + 1, 128)        # aligned b1 and (w2|b2) segments
    NP = AH + 2 * SEG

    # layer-0: [ W_hw1 | W_hb1 | W_hw2 | W_hb2 | E (q expansion, 0/1) ]
    w0e = np.zeros((F, K4 + AH), np.float32)
    b0 = np.zeros((1, K4), np.float32)
    firsts = [(hw1_w0, hw1_b0), (hb1_w0, hb1_b0), (hw2_w0, hw2_b0), (hb2_w0, hb2_b0)]
    for i, (w, b) in enumerate(firsts):
        w0e[:S, i * H:(i + 1) * H] = np.asarray(w, np.float32)
        b0[:, i * H:(i + 1) * H] = np.asarray(b, np.float32)
    for a in range(A):                 # q[:, a] -> q_expand lanes [a*H, (a+1)*H)
        w0e[S + a, K4 + a * H:K4 + (a + 1) * H] = 1.0

    # layer-1 (block-diagonal), 128-lane aligned output segments.
    w1 = np.zeros((K4, NP), np.float32)
    b1 = np.zeros((1, NP), np.float32)
    w1[0 * H:1 * H, 0:A * H] = np.asarray(hw1_w1, np.float32)
    b1[:, 0:A * H] = np.asarray(hw1_b1, np.float32)
    w1[1 * H:2 * H, AH:AH + H] = np.asarray(hb1_w1, np.float32)
    b1[:, AH:AH + H] = np.asarray(hb1_b1, np.float32)
    b1[:, AH + H] = 1.0                # hidden lane H becomes ELU(1)=1 -> carries b2
    w1[2 * H:3 * H, AH + SEG:AH + SEG + H] = np.asarray(hw2_w1, np.float32)
    b1[:, AH + SEG:AH + SEG + H] = np.asarray(hw2_b1, np.float32)
    w1[3 * H:4 * H, AH + SEG + H:AH + SEG + H + 1] = np.asarray(hb2_w1, np.float32)
    b1[:, AH + SEG + H] = np.asarray(hb2_b1, np.float32)[0, 0]

    # constant 0/1 reduction matrix: mix = (q_expand * |w1|) @ R  (agent sum on MXU)
    r = np.zeros((AH, SEG), np.float32)
    for a in range(A):
        r[a * H:(a + 1) * H, 0:H] = np.eye(H, dtype=np.float32)

    packed = (jnp.asarray(w0e), jnp.asarray(b0), jnp.asarray(w1),
              jnp.asarray(b1), jnp.asarray(r))
    return packed, (F, K4, AH, SEG)


# --------------------------------------------------------------------------- #
# Wrapper
# --------------------------------------------------------------------------- #
def mixing_network_forward(agent_qs, states, params, *, block_rows=2048):
    """params: ordered list of 16 arrays (W [in,out] / b [1,out] of the 4 hyper-nets)."""
    B, A = agent_qs.shape
    _, S = states.shape
    H = params[7].shape[-1]            # hyper_b1 layer-1 bias -> mixing_hidden_dim

    (w0e, b0, w1, b1, r), (F, K4, AH, SEG) = pack_params(params, A, S, H)

    # Single streamed input: x = [states | agent_qs | zero pad] -> one DMA stream.
    x = jnp.concatenate(
        [states.astype(jnp.float32), agent_qs.astype(jnp.float32),
         jnp.zeros((B, F - S - A), jnp.float32)], axis=1)

    # Batch tiling: large tiles amortize per-step overhead (single-core v5e/v6e);
    # keep the number of grid steps even when >1 so v7x's 2 TCs stay balanced.
    BB = min(_round_up(block_rows, 128), _round_up(B, 128))
    G = pl.cdiv(B, BB)
    if G > 1 and G % 2 == 1:
        G += 1
    BB = _round_up(pl.cdiv(B, G), 128)
    G = pl.cdiv(B, BB)
    Bp = G * BB
    if Bp != B:
        x = jnp.pad(x, ((0, Bp - B), (0, 0)))

    kernel = functools.partial(_mixing_kernel, hidden_dim=H, k4=K4, ah_pad=AH, seg=SEG)

    out = pl.pallas_call(
        kernel,
        out_shape=jax.ShapeDtypeStruct((G, 1, BB), jnp.float32),
        grid_spec=pltpu.PrefetchScalarGridSpec(
            num_scalar_prefetch=0,
            grid=(G,),
            in_specs=[
                pl.BlockSpec((BB, F), lambda i: (i, 0)),      # streamed batch tile
                pl.BlockSpec(w0e.shape, lambda i: (0, 0)),    # packed weights stay resident
                pl.BlockSpec(b0.shape, lambda i: (0, 0)),
                pl.BlockSpec(w1.shape, lambda i: (0, 0)),
                pl.BlockSpec(b1.shape, lambda i: (0, 0)),
                pl.BlockSpec(r.shape, lambda i: (0, 0)),
            ],
            out_specs=pl.BlockSpec((1, 1, BB), lambda i: (i, 0, 0)),
        ),
        compiler_params=pltpu.CompilerParams(
            dimension_semantics=("parallel",),
            vmem_limit_bytes=32 * 1024 * 1024,   # headroom for BB up to 2048 on v5e
        ),
    )(x, w0e, b0, w1, b1, r)

    return out.reshape(Bp)[:B].reshape(B, 1)


# --------------------------------------------------------------------------- #
# Deterministic parameter construction (mimics nn.Linear default init shapes)
# --------------------------------------------------------------------------- #
def init_params(key, state_size, num_agents, hidden_dim):
    def linear(key, fan_in, fan_out):
        kw, kb = jax.random.split(key)
        bound = 1.0 / np.sqrt(fan_in)
        w = jax.random.uniform(kw, (fan_in, fan_out), jnp.float32, -bound, bound)
        b = jax.random.uniform(kb, (1, fan_out), jnp.float32, -bound, bound)
        return w, b

    keys = jax.random.split(key, 8)
    params = []
    params += list(linear(keys[0], state_size, hidden_dim))                 # hyper_w1 L0
    params += list(linear(keys[1], hidden_dim, num_agents * hidden_dim))    # hyper_w1 L1
    params += list(linear(keys[2], state_size, hidden_dim))                 # hyper_b1 L0
    params += list(linear(keys[3], hidden_dim, hidden_dim))                 # hyper_b1 L1
    params += list(linear(keys[4], state_size, hidden_dim))                 # hyper_w2 L0
    params += list(linear(keys[5], hidden_dim, hidden_dim))                 # hyper_w2 L1
    params += list(linear(keys[6], state_size, hidden_dim))                 # hyper_b2 L0
    params += list(linear(keys[7], hidden_dim, 1))                          # hyper_b2 L1
    return params


# --------------------------------------------------------------------------- #
# Pure-JAX reference (mirrors the PyTorch forward) for correctness check
# --------------------------------------------------------------------------- #
def reference_forward(agent_qs, states, params):
    (hw1_w0, hw1_b0, hw1_w1, hw1_b1,
     hb1_w0, hb1_b0, hb1_w1, hb1_b1,
     hw2_w0, hw2_b0, hw2_w1, hw2_b1,
     hb2_w0, hb2_b0, hb2_w1, hb2_b1) = params
    B, A = agent_qs.shape
    H = hb1_b1.shape[-1]
    hp = jax.lax.Precision.HIGHEST

    def mlp(x, w0, b0, w1, b1):
        h = jnp.maximum(jnp.dot(x, w0, precision=hp) + b0, 0.0)
        return jnp.dot(h, w1, precision=hp) + b1

    w1 = jnp.abs(mlp(states, hw1_w0, hw1_b0, hw1_w1, hw1_b1)).reshape(B, A, H)
    b1 = mlp(states, hb1_w0, hb1_b0, hb1_w1, hb1_b1).reshape(B, 1, H)
    w2 = jnp.abs(mlp(states, hw2_w0, hw2_b0, hw2_w1, hw2_b1)).reshape(B, H, 1)
    b2 = mlp(states, hb2_w0, hb2_b0, hb2_w1, hb2_b1).reshape(B, 1, 1)

    hidden = jax.nn.elu(
        jnp.einsum("ba,bah->bh", agent_qs, w1, precision=hp)[:, None, :] + b1)
    q_tot = jnp.einsum("bqh,bho->bqo", hidden, w2, precision=hp) + b2
    return q_tot[:, :, 0]  # [B, 1]


if __name__ == "__main__":
    A, S, H = 4, 32, 32   # num_agents, central_state_size, mixing_hidden_dim
    key = jax.random.PRNGKey(0)
    k_q, k_s, k_p, k_q2, k_s2 = jax.random.split(key, 5)
    params = init_params(k_p, S, A, H)

    # --- small test (single padded block) ---
    B = 8
    agent_qs = jax.random.normal(k_q, (B, A), jnp.float32)
    states = jax.random.normal(k_s, (B, S), jnp.float32)
    out = jax.block_until_ready(mixing_network_forward(agent_qs, states, params))
    ref = reference_forward(agent_qs, states, params)
    np.testing.assert_allclose(np.asarray(out), np.asarray(ref), rtol=1e-5, atol=1e-5)

    # --- larger test (multi-step grid, exercises batch tiling + padding) ---
    B2 = 2500
    agent_qs2 = jax.random.normal(k_q2, (B2, A), jnp.float32)
    states2 = jax.random.normal(k_s2, (B2, S), jnp.float32)
    out2 = jax.block_until_ready(mixing_network_forward(agent_qs2, states2, params))
    ref2 = reference_forward(agent_qs2, states2, params)
    np.testing.assert_allclose(np.asarray(out2), np.asarray(ref2), rtol=1e-5, atol=1e-5)

    print("KERNEL_OK")
</pallas_src>

<mosaic_0001>
module attributes {stable_mosaic.version = 11 : i64} {
  func.func @_mixing_kernel(%arg0: i32, %arg1: memref<128x40xf32, #tpu.memory_space<vmem>>, %arg2: memref<40x256xf32, #tpu.memory_space<vmem>>, %arg3: memref<1x128xf32, #tpu.memory_space<vmem>>, %arg4: memref<128x384xf32, #tpu.memory_space<vmem>>, %arg5: memref<1x384xf32, #tpu.memory_space<vmem>>, %arg6: memref<128x128xf32, #tpu.memory_space<vmem>>, %arg7: memref<1x1x128xf32, #tpu.memory_space<vmem>>) attributes {dimension_semantics = [#tpu.dimension_semantics<parallel>], iteration_bounds = array<i64: 1>, scalar_prefetch = 0 : i64, scratch_operands = 0 : i64, tpu.core_type = #tpu.core_type<tc>, window_params = [{transform_indices = @transform_0, window_bounds = array<i64: 128, 40>}, {pipeline_mode = #tpu.pipeline_mode<synchronous>, transform_indices = @transform_1, window_bounds = array<i64: 40, 256>}, {pipeline_mode = #tpu.pipeline_mode<synchronous>, transform_indices = @transform_2, window_bounds = array<i64: 1, 128>}, {pipeline_mode = #tpu.pipeline_mode<synchronous>, transform_indices = @transform_3, window_bounds = array<i64: 128, 384>}, {pipeline_mode = #tpu.pipeline_mode<synchronous>, transform_indices = @transform_4, window_bounds = array<i64: 1, 384>}, {pipeline_mode = #tpu.pipeline_mode<synchronous>, transform_indices = @transform_5, window_bounds = array<i64: 128, 128>}, {transform_indices = @transform_6, window_bounds = array<i64: 1, 1, 128>}]} {
    %c0 = arith.constant 0 : index
    %c0_0 = arith.constant 0 : index
    %0 = vector.load %arg1[%c0, %c0_0] : memref<128x40xf32, #tpu.memory_space<vmem>>, vector<128x40xf32>
    %c0_1 = arith.constant 0 : index
    %c0_2 = arith.constant 0 : index
    %1 = vector.load %arg2[%c0_1, %c0_2] : memref<40x256xf32, #tpu.memory_space<vmem>>, vector<40x256xf32>
    %cst = arith.constant dense<0.000000e+00> : vector<128x256xf32>
    %2 = tpu.matmul %0, %1, %cst {dimension_numbers = #tpu.dot_dimension_numbers<[1], [0], [0], [1], [0, 0, 1, 1], [], []>} : vector<128x40xf32>, vector<40x256xf32>, vector<128x256xf32> -> vector<128x256xf32>
    %3 = vector.extract_strided_slice %2 {offsets = [0, 0], sizes = [128, 128], strides = [1, 1]} : vector<128x256xf32> to vector<128x128xf32>
    %c0_3 = arith.constant 0 : index
    %c0_4 = arith.constant 0 : index
    %4 = vector.load %arg3[%c0_3, %c0_4] : memref<1x128xf32, #tpu.memory_space<vmem>>, vector<1x128xf32>
    %5 = vector.broadcast %4 : vector<1x128xf32> to vector<128x128xf32>
    %6 = arith.addf %3, %5 : vector<128x128xf32>
    %cst_5 = arith.constant 0.000000e+00 : f32
    %7 = vector.broadcast %cst_5 : f32 to vector<128x128xf32>
    %8 = arith.maximumf %6, %7 : vector<128x128xf32>
    %9 = vector.extract_strided_slice %2 {offsets = [0, 128], sizes = [128, 128], strides = [1, 1]} : vector<128x256xf32> to vector<128x128xf32>
    %c0_6 = arith.constant 0 : index
    %c0_7 = arith.constant 0 : index
    %10 = vector.load %arg4[%c0_6, %c0_7] : memref<128x384xf32, #tpu.memory_space<vmem>>, vector<128x384xf32>
    %cst_8 = arith.constant dense<0.000000e+00> : vector<128x384xf32>
    %11 = tpu.matmul %8, %10, %cst_8 {dimension_numbers = #tpu.dot_dimension_numbers<[1], [0], [0], [1], [0, 0, 1, 1], [], []>} : vector<128x128xf32>, vector<128x384xf32>, vector<128x384xf32> -> vector<128x384xf32>
    %c0_9 = arith.constant 0 : index
    %c0_10 = arith.constant 0 : index
    %12 = vector.load %arg5[%c0_9, %c0_10] : memref<1x384xf32, #tpu.memory_space<vmem>>, vector<1x384xf32>
    %13 = vector.broadcast %12 : vector<1x384xf32> to vector<128x384xf32>
    %14 = arith.addf %11, %13 : vector<128x384xf32>
    %15 = vector.extract_strided_slice %14 {offsets = [0, 0], sizes = [128, 128], strides = [1, 1]} : vector<128x384xf32> to vector<128x128xf32>
    %16 = math.absf %15 : vector<128x128xf32>
    %17 = arith.mulf %9, %16 : vector<128x128xf32>
    %c0_11 = arith.constant 0 : index
    %c0_12 = arith.constant 0 : index
    %18 = vector.load %arg6[%c0_11, %c0_12] : memref<128x128xf32, #tpu.memory_space<vmem>>, vector<128x128xf32>
    %cst_13 = arith.constant dense<0.000000e+00> : vector<128x128xf32>
    %19 = tpu.matmul %17, %18, %cst_13 {dimension_numbers = #tpu.dot_dimension_numbers<[1], [0], [0], [1], [0, 0, 1, 1], [], []>} : vector<128x128xf32>, vector<128x128xf32>, vector<128x128xf32> -> vector<128x128xf32>
    %20 = vector.extract_strided_slice %14 {offsets = [0, 128], sizes = [128, 128], strides = [1, 1]} : vector<128x384xf32> to vector<128x128xf32>
    %21 = arith.addf %19, %20 : vector<128x128xf32>
    %cst_14 = arith.constant 0.000000e+00 : f32
    %22 = vector.broadcast %cst_14 : f32 to vector<128x128xf32>
    %23 = arith.cmpf ogt, %21, %22 : vector<128x128xf32>
    %cst_15 = arith.constant 0.000000e+00 : f32
    %24 = vector.broadcast %cst_15 : f32 to vector<128x128xf32>
    %25 = arith.minimumf %21, %24 : vector<128x128xf32>
    %26 = math.exp %25 : vector<128x128xf32>
    %cst_16 = arith.constant 1.000000e+00 : f32
    %27 = vector.broadcast %cst_16 : f32 to vector<128x128xf32>
    %28 = arith.subf %26, %27 : vector<128x128xf32>
    %29 = arith.select %23, %21, %28 : vector<128x128xi1>, vector<128x128xf32>
    %30 = vector.extract_strided_slice %14 {offsets = [0, 256], sizes = [128, 128], strides = [1, 1]} : vector<128x384xf32> to vector<128x128xf32>
    %31 = tpu.iota {dimensions = array<i32: 1>} : vector<1x128xi32>
    %c32_i32 = arith.constant 32 : i32
    %32 = vector.broadcast %c32_i32 : i32 to vector<1x128xi32>
    %33 = arith.cmpi slt, %31, %32 : vector<1x128xi32>
    %34 = math.absf %30 : vector<128x128xf32>
    %35 = vector.shape_cast %33 : vector<1x128xi1> to vector<1x128xi1>
    %36 = vector.broadcast %35 : vector<1x128xi1> to vector<128x128xi1>
    %37 = arith.select %36, %34, %30 : vector<128x128xi1>, vector<128x128xf32>
    %38 = arith.mulf %29, %37 : vector<128x128xf32>
    %cst_17 = arith.constant 1.000000e+00 : f32
    %39 = vector.broadcast %cst_17 : f32 to vector<1x128xf32>
    %cst_18 = arith.constant dense<0.000000e+00> : vector<1x128xf32>
    %40 = tpu.matmul %39, %38, %cst_18 {dimension_numbers = #tpu.dot_dimension_numbers<[1], [1], [0], [0], [0, 0, 1, 0], [], []>} : vector<1x128xf32>, vector<128x128xf32>, vector<1x128xf32> -> vector<1x128xf32>
    %41 = vector.shape_cast %40 : vector<1x128xf32> to vector<1x1x128xf32>
    %c0_19 = arith.constant 0 : index
    %c0_20 = arith.constant 0 : index
    %c0_21 = arith.constant 0 : index
    %42 = vector.load %arg7[%c0_19, %c0_20, %c0_21] : memref<1x1x128xf32, #tpu.memory_space<vmem>>, vector<1x1x128xf32>
    tpu.vector_store %arg7[%c0_19, %c0_20, %c0_21], %41 {strides = array<i32>} : memref<1x1x128xf32, #tpu.memory_space<vmem>>, vector<1x1x128xf32>,
    return
  }
  func.func @transform_0(%arg0: i32) -> (i32, i32) {
    %c0_i32 = arith.constant 0 : i32
    %c0_i32_0 = arith.constant 0 : i32
    return %arg0, %c0_i32 : i32, i32
  }
  func.func @transform_1(%arg0: i32) -> (i32, i32) {
    %c0_i32 = arith.constant 0 : i32
    %c0_i32_0 = arith.constant 0 : i32
    %c0_i32_1 = arith.constant 0 : i32
    return %c0_i32, %c0_i32_0 : i32, i32
  }
  func.func @transform_2(%arg0: i32) -> (i32, i32) {
    %c0_i32 = arith.constant 0 : i32
    %c0_i32_0 = arith.constant 0 : i32
    %c0_i32_1 = arith.constant 0 : i32
    return %c0_i32, %c0_i32_0 : i32, i32
  }
  func.func @transform_3(%arg0: i32) -> (i32, i32) {
    %c0_i32 = arith.constant 0 : i32
    %c0_i32_0 = arith.constant 0 : i32
    %c0_i32_1 = arith.constant 0 : i32
    return %c0_i32, %c0_i32_0 : i32, i32
  }
  func.func @transform_4(%arg0: i32) -> (i32, i32) {
    %c0_i32 = arith.constant 0 : i32
    %c0_i32_0 = arith.constant 0 : i32
    %c0_i32_1 = arith.constant 0 : i32
    return %c0_i32, %c0_i32_0 : i32, i32
  }
  func.func @transform_5(%arg0: i32) -> (i32, i32) {
    %c0_i32 = arith.constant 0 : i32
    %c0_i32_0 = arith.constant 0 : i32
    %c0_i32_1 = arith.constant 0 : i32
    return %c0_i32, %c0_i32_0 : i32, i32
  }
  func.func @transform_6(%arg0: i32) -> (i32, i32, i32) {
    %c0_i32 = arith.constant 0 : i32
    %c0_i32_0 = arith.constant 0 : i32
    %c0_i32_1 = arith.constant 0 : i32
    return %arg0, %c0_i32, %c0_i32_0 : i32, i32, i32
  }
}

</mosaic_0001>

<bundles_post_ra>
// kernel: tpu_custom_call.1
= control target key start
LH: loop header
LB: loop body
LE: loop exit
PB: predicated region body
PF: predicated region fallthrough
CT: control target
= control target key end

     0   :  { %11 = vsyncpa [#allocation3], 0  ;;  %s1481_s0 = inlined_call_operand.vmem [shape: f32[128,40], index: 0, kind: input, shape index: {}]   ;;  %s1482_s1 = inlined_call_operand.hbm [shape: f32[40,256], index: 1, kind: input, shape index: {}]   ;;  %s1483_s2 = inlined_call_operand.vmem [shape: f32[1,128], index: 2, kind: input, shape index: {}]   ;;  %s1484_s3 = inlined_call_operand.hbm [shape: f32[128,384], index: 3, kind: input, shape index: {}]   ;;  %s1485_s4 = inlined_call_operand.vmem [shape: f32[1,384], index: 4, kind: input, shape index: {}]   ;;  %s1486_s5 = inlined_call_operand.vmem [shape: f32[128,128], index: 5, kind: input, shape index: {}]   ;;  %s1487_s6 = inlined_call_operand.hbm [shape: f32[1,1,128], index: 6, kind: output, shape index: {}]  }
   0x1   :  { %12 = vsyncpa [#allocation6], 0 }
   0x2   :  { %13 = vsyncpa [#allocation4], 0  ;;  %s20_s23 = sshll.u32 %s1482_s1, 4  ;;  %s1026_s24 = smov [#allocation2]   ;;  %s21_s23 = int_to_ptr.hbm [resolvable:$true] %s20_s23 }
   0x3   :  { %s22_s25 = sshll.u32 %s1026_s24, 4  ;;  %s35_s28 = sshll.u32 %s1484_s3, 4  ;;  %s23_s25 = int_to_ptr.vmem [resolvable:$true] %s22_s25  ;;  %s36_s28 = int_to_ptr.hbm [resolvable:$true] %s35_s28 }
   0x4   :  { %s1027_s29 = smov 256   ;;  %s1028_s30 = smov 16  }
   0x5   :  { %28 = dma.hbm_to_vmem [thread:$0]  %s21_s23, 1280, %s23_s25, [#allocation3], %s1027_s29, %s1027_s29, %s1028_s30  }
   0x6   :  { %s1029_s7 = smov [#allocation5]   ;;  %s1030_s9 = smov 384  }
   0x7   :  { %s37_s8 = sshll.u32 %s1029_s7, 4  ;;  %s1031_s10 = smov 24   ;;  %s38_s8 = int_to_ptr.vmem [resolvable:$true] %s37_s8 }
   0x8   :  { %43 = dma.hbm_to_vmem [thread:$0]  %s36_s28, 6144, %s38_s8, [#allocation6], %s1030_s9, %s1030_s9, %s1031_s10  }
   0x9   :  { %1020 = dma.done.wait [#allocation3], 1280  }
   0xa   :  { %1021 = vsyncadd [#allocation3], 4294966016 }
   0xb   :  { %1022 = dma.done.wait [#allocation6], 6144  }
   0xc   :  { %1023 = vsyncadd [#allocation6], 4294961152  ;;  %v80_v0 = vld [vmem:[#allocation2 + $0x40] sm:$0xff]  ;;  %v78_v1 = vld [vmem:[#allocation2 + $0x30] sm:$0xff]  ;;  %vm82_vm0 = vcmask 326656   ;;  %s838_s23 = sshll.u32 %s1487_s6, 4  ;;  %s839_s23 = int_to_ptr.hbm [resolvable:$true] %s838_s23 }
   0xd   :  { %142 = vmatpush.msra.mxu0 %v80_v0  ;;  %897 = vmatpush.msra.mxu3 %v80_v0  ;;  %v76_v2 = vld [vmem:[#allocation2 + $0x20] sm:$0xff]  ;;  %v74_v3 = vld [vmem:[#allocation2 + $0x10] sm:$0xff]  ;;  %v1085_v6 = vld [vmem:[%s1481_s0 + $0x8] sm:$0xff] }
   0xe   :  { %v72_v4 = vld [vmem:[#allocation2] sm:$0xff]  ;;  %v1092_v7 = vld [vmem:[%s1481_s0 + $0x10] sm:$0xff]  ;;  %v1099_v8 = vld [vmem:[%s1481_s0 + $0x18] sm:$0xff] }
   0xf   :  { %143 = vmatpush.msra.mxu0 %v78_v1  ;;  %898 = vmatpush.msra.mxu3 %v78_v1  ;;  %v1078_v5 = vld [vmem:[%s1481_s0] sm:$0xff]  ;;  %v81_v10 = vld [vmem:[#allocation2 + $0x48] sm:$0xff]  ;;  %v79_v12 = vld [vmem:[#allocation2 + $0x38] sm:$0xff] }
  0x10   :  { %v1106_v9 = vld [vmem:[%s1481_s0 + $0x20] sm:$0xff]  ;;  %v65_v11 = vld [vmem:[%s1481_s0 + $0x48] sm:$0xff]  ;;  %902 = vmatpush.msra.mxu2 %v81_v10  ;;  %207 = vmatpush.msra.mxu1 %v81_v10  ;;  %v75_v15 = vld [vmem:[#allocation2 + $0x18] sm:$0xff] }
  0x11   :  { %144 = vmatpush.msra.mxu0 %v76_v2  ;;  %899 = vmatpush.msra.mxu3 %v76_v2  ;;  %v77_v13 = vld [vmem:[#allocation2 + $0x28] sm:$0xff]  ;;  %v343_v14 = vld [vmem:[#allocation5 + $0x170] sm:$0xff]  ;;  %v341_v19 = vld [vmem:[#allocation5 + $0x160] sm:$0xff] }
  0x12   :  { %903 = vmatpush.msra.mxu2 %v79_v12  ;;  %v344_v16 = vld [vmem:[#allocation5 + $0x178] sm:$0xff]  ;;  %208 = vmatpush.msra.mxu1 %v79_v12  ;;  %v337_v20 = vld [vmem:[#allocation5 + $0x140] sm:$0xff]  ;;  %v338_v23 = vld [vmem:[#allocation5 + $0x148] sm:$0xff] }
  0x13   :  { %145 = vmatpush.msra.mxu0 %v74_v3  ;;  %900 = vmatpush.msra.mxu3 %v74_v3  ;;  %v340_v17 = vld [vmem:[#allocation5 + $0x158] sm:$0xff]  ;;  %v66_v22 = vld [vmem:[%s1481_s0 + $0x50] sm:$0xff]  ;;  %v342_v24 = vld [vmem:[#allocation5 + $0x168] sm:$0xff] }
  0x14   :  { %v1117_v18 = vld [vmem:[%s1481_s0 + $0x28] sm:$0xff]  ;;  %904 = vmatpush.msra.mxu2 %v77_v13  ;;  %209 = vmatpush.msra.mxu1 %v77_v13  ;;  %v334_v25 = vld [vmem:[#allocation5 + $0x128] sm:$0xff]  ;;  %v335_v26 = vld [vmem:[#allocation5 + $0x130] sm:$0xff] }
  0x15   :  { %146 = vmatpush.msra.mxu0 %v72_v4  ;;  %901 = vmatpush.msra.mxu3 %v72_v4  ;;  %v73_v21 = vld [vmem:[#allocation2 + $0x8] sm:$0xff]  ;;  %v339_v27 = vld [vmem:[#allocation5 + $0x150] sm:$0xff]  ;;  %v1129_v32 = vld [vmem:[%s1481_s0 + $0x30] sm:$0xff] }
  0x16   :  { %849 = vmatmul.msk.f32.vlgmr.msra.gmra.mxu0 %vm82_vm0, %v1078_v5  ;;  %858 = vmatmul.msk.f32.vlgmr.msra.gmra.mxu3 %vm82_vm0, %v65_v11  ;;  %v331_v28 = vld [vmem:[#allocation5 + $0x110] sm:$0xff]  ;;  %v332_v29 = vld [vmem:[#allocation5 + $0x118] sm:$0xff]  ;;  %v67_v33 = vld [vmem:[%s1481_s0 + $0x58] sm:$0xff] }
  0x17   :  { %418 = vmatpush.msrb.mxu3 %v343_v14  ;;  %483 = vmatpush.msrb.mxu0 %v344_v16  ;;  %v336_v30 = vld [vmem:[#allocation5 + $0x138] sm:$0xff]  ;;  %v333_v34 = vld [vmem:[#allocation5 + $0x120] sm:$0xff]  ;;  %v330_v36 = vld [vmem:[#allocation5 + $0x108] sm:$0xff] }
  0x18   :  { %905 = vmatpush.msra.mxu2 %v75_v15  ;;  %v328_v31 = vld [vmem:[#allocation5 + $0xf8] sm:$0xff]  ;;  %210 = vmatpush.msra.mxu1 %v75_v15  ;;  %v329_v35 = vld [vmem:[#allocation5 + $0x100] sm:$0xff]  ;;  %v326_v38 = vld [vmem:[#allocation5 + $0xe8] sm:$0xff] }
  0x19   :  { %419 = vmatpush.msrb.mxu3 %v340_v17  ;;  %484 = vmatpush.msrb.mxu0 %v341_v19  ;;  %v325_v37 = vld [vmem:[#allocation5 + $0xe0] sm:$0xff]  ;;  %v327_v39 = vld [vmem:[#allocation5 + $0xf0] sm:$0xff]  ;;  %v322_v40 = vld [vmem:[#allocation5 + $0xc8] sm:$0xff] }
  0x1a   :  { %906 = vmatpush.msra.mxu2 %v73_v21  ;;  %211 = vmatpush.msra.mxu1 %v73_v21  ;;  %v323_v41 = vld [vmem:[#allocation5 + $0xd0] sm:$0xff]  ;;  %v324_v42 = vld [vmem:[#allocation5 + $0xd8] sm:$0xff]  ;;  %v1143_v44 = vld [vmem:[%s1481_s0 + $0x38] sm:$0xff] }
  0x1b   :  { %420 = vmatpush.msrb.mxu3 %v337_v20  ;;  %874 = vmatmul.msk.f32.vlgmr.msra.gmra.mxu2 %vm82_vm0, %v65_v11  ;;  %v319_v43 = vld [vmem:[#allocation5 + $0xb0] sm:$0xff]  ;;  %v321_v46 = vld [vmem:[#allocation5 + $0xc0] sm:$0xff]  ;;  %v320_v47 = vld [vmem:[#allocation5 + $0xb8] sm:$0xff] }
  0x1c   :  { %485 = vmatpush.msrb.mxu0 %v338_v23  ;;  %353 = vmatpush.msrb.mxu2 %v342_v24  ;;  %v68_v45 = vld [vmem:[%s1481_s0 + $0x60] sm:$0xff]  ;;  %v318_v48 = vld [vmem:[#allocation5 + $0xa8] sm:$0xff]  ;;  %v316_v49 = vld [vmem:[#allocation5 + $0x98] sm:$0xff] }
  0x1d   :  { %421 = vmatpush.msrb.mxu3 %v334_v25  ;;  %865 = vmatmul.msk.f32.vlgmr.msra.gmra.mxu1 %vm82_vm0, %v1078_v5  ;;  %v317_v50 = vld [vmem:[#allocation5 + $0xa0] sm:$0xff]  ;;  %v315_v51 = vld [vmem:[#allocation5 + $0x90] sm:$0xff]  ;;  %v314_v53 = vld [vmem:[#allocation5 + $0x88] sm:$0xff] }
  0x1e   :  { %850 = vmatmul.msk.f32.gmra.mxu0 %vm82_vm0, %v1085_v6  ;;  %859 = vmatmul.msk.f32.gmra.mxu3 %vm82_vm0, %v66_v22  ;;  %v313_v52 = vld [vmem:[#allocation5 + $0x80] sm:$0xff]  ;;  %v312_v54 = vld [vmem:[#allocation5 + $0x78] sm:$0xff]  ;;  %v310_v55 = vld [vmem:[#allocation5 + $0x68] sm:$0xff] }
  0x1f   :  { %486 = vmatpush.msrb.mxu0 %v335_v26  ;;  %354 = vmatpush.msrb.mxu2 %v339_v27  ;;  %v64_v56 = vld [vmem:[%s1481_s0 + $0x40] sm:$0xff]  ;;  %v69_v57 = vld [vmem:[%s1481_s0 + $0x68] sm:$0xff]  ;;  %v309_v58 = vld [vmem:[#allocation5 + $0x60] sm:$0xff] }
  0x20   :  { %422 = vmatpush.msrb.mxu3 %v331_v28  ;;  %v311_v59 = vld [vmem:[#allocation5 + $0x70] sm:$0xff]  ;;  %v306_v60 = vld [vmem:[#allocation5 + $0x48] sm:$0xff]  ;;  %v308_v62 = vld [vmem:[#allocation5 + $0x58] sm:$0xff] }
  0x21   :  { %487 = vmatpush.msrb.mxu0 %v332_v29  ;;  %355 = vmatpush.msrb.mxu2 %v336_v30  ;;  %v307_v61 = vld [vmem:[#allocation5 + $0x50] sm:$0xff]  ;;  %v70_v63 = vld [vmem:[%s1481_s0 + $0x70] sm:$0xff]  ;;  %v71_v0 = vld [vmem:[%s1481_s0 + $0x78] sm:$0xff] }
  0x22   :  { %423 = vmatpush.msrb.mxu3 %v328_v31  ;;  %v303_v1 = vld [vmem:[#allocation5 + $0x30] sm:$0xff]  ;;  %v304_v2 = vld [vmem:[#allocation5 + $0x38] sm:$0xff]  ;;  %v305_v3 = vld [vmem:[#allocation5 + $0x40] sm:$0xff] }
  0x23   :  { %356 = vmatpush.msrb.mxu2 %v333_v34  ;;  %488 = vmatpush.msrb.mxu0 %v329_v35  ;;  %v300_v4 = vld [vmem:[#allocation5 + $0x18] sm:$0xff]  ;;  %v301_v5 = vld [vmem:[#allocation5 + $0x20] sm:$0xff]  ;;  %v1190_v10 = vld [vmem:[%s1483_s2] ss:$0 sm:$0xff] }
  0x24   :  { %875 = vmatmul.msk.f32.gmra.mxu2 %vm82_vm0, %v66_v22  ;;  %424 = vmatpush.msrb.mxu3 %v325_v37 }
  0x25   :  { %357 = vmatpush.msrb.mxu2 %v330_v36  ;;  %489 = vmatpush.msrb.mxu0 %v326_v38 }
  0x26   :  { %851 = vmatmul.msk.f32.gmra.mxu0 %vm82_vm0, %v1092_v7  ;;  %860 = vmatmul.msk.f32.gmra.mxu3 %vm82_vm0, %v67_v33 }
  0x27   :  { %358 = vmatpush.msrb.mxu2 %v327_v39  ;;  %425 = vmatpush.msrb.mxu3 %v322_v40 }
  0x28   :  { %490 = vmatpush.msrb.mxu0 %v323_v41  ;;  %866 = vmatmul.msk.f32.gmra.mxu1 %vm82_vm0, %v1085_v6  ;;  %v302_v6 = vld [vmem:[#allocation5 + $0x28] sm:$0xff] }
  0x29   :  { %359 = vmatpush.msrb.mxu2 %v324_v42  ;;  %426 = vmatpush.msrb.mxu3 %v319_v43 }
  0x2a   :  { %491 = vmatpush.msrb.mxu0 %v320_v47  ;;  %v594_v47 = vld [vmem:[%s1486_s5 + $0x70] sm:$0xff] }
  0x2b   :  { %360 = vmatpush.msrb.mxu2 %v321_v46  ;;  %427 = vmatpush.msrb.mxu3 %v316_v49  ;;  %v595_v46 = vld [vmem:[%s1486_s5 + $0x78] sm:$0xff] }
  0x2c   :  { %876 = vmatmul.msk.f32.gmra.mxu2 %vm82_vm0, %v67_v33  ;;  %492 = vmatpush.msrb.mxu0 %v317_v50 }
  0x2d   :  { %361 = vmatpush.msrb.mxu2 %v318_v48  ;;  %428 = vmatpush.msrb.mxu3 %v313_v52  ;;  %v593_v48 = vld [vmem:[%s1486_s5 + $0x68] sm:$0xff] }
  0x2e   :  { %852 = vmatmul.msk.f32.gmra.mxu0 %vm82_vm0, %v1099_v8  ;;  %861 = vmatmul.msk.f32.gmra.mxu3 %vm82_vm0, %v68_v45 }
  0x2f   :  { %362 = vmatpush.msrb.mxu2 %v315_v51  ;;  %493 = vmatpush.msrb.mxu0 %v314_v53  ;;  %v592_v53 = vld [vmem:[%s1486_s5 + $0x60] sm:$0xff] }
  0x30   :  { %429 = vmatpush.msrb.mxu3 %v310_v55  ;;  %867 = vmatmul.msk.f32.gmra.mxu1 %vm82_vm0, %v1092_v7  ;;  %v297_v7 = vld [vmem:[#allocation5] sm:$0xff] }
  0x31   :  { %363 = vmatpush.msrb.mxu2 %v312_v54  ;;  %494 = vmatpush.msrb.mxu0 %v311_v59  ;;  %v591_v54 = vld [vmem:[%s1486_s5 + $0x58] sm:$0xff]  ;;  %v590_v55 = vld [vmem:[%s1486_s5 + $0x50] sm:$0xff] }
  0x32   :  { %430 = vmatpush.msrb.mxu3 %v307_v61  ;;  %596 = vmatpush.msrb.mxu1 %v595_v46  ;;  %v587_v61 = vld [vmem:[%s1486_s5 + $0x38] sm:$0xff] }
  0x33   :  { %364 = vmatpush.msrb.mxu2 %v309_v58  ;;  %495 = vmatpush.msrb.mxu0 %v308_v62 }
  0x34   :  { %877 = vmatmul.msk.f32.gmra.mxu2 %vm82_vm0, %v68_v45  ;;  %431 = vmatpush.msrb.mxu3 %v304_v2 }
  0x35   :  { %365 = vmatpush.msrb.mxu2 %v306_v60  ;;  %496 = vmatpush.msrb.mxu0 %v305_v3  ;;  %v588_v60 = vld [vmem:[%s1486_s5 + $0x40] sm:$0xff] }
  0x36   :  { %853 = vmatmul.msk.f32.gmra.mxu0 %vm82_vm0, %v1106_v9  ;;  %862 = vmatmul.msk.f32.gmra.mxu3 %vm82_vm0, %v69_v57  ;;  %v584_v3 = vld [vmem:[%s1486_s5 + $0x20] sm:$0xff] }
  0x37   :  { %366 = vmatpush.msrb.mxu2 %v303_v1  ;;  %432 = vmatpush.msrb.mxu3 %v301_v5  ;;  %v585_v1 = vld [vmem:[%s1486_s5 + $0x28] sm:$0xff]  ;;  %v583_v5 = vld [vmem:[%s1486_s5 + $0x18] sm:$0xff] }
  0x38   :  { %868 = vmatmul.msk.f32.gmra.mxu1 %vm82_vm0, %v1099_v8  ;;  %497 = vmatpush.msrb.mxu0 %v302_v6  ;;  %v298_v8 = vld [vmem:[#allocation5 + $0x8] sm:$0xff] }
  0x39   :  { %367 = vmatpush.msrb.mxu2 %v300_v4  ;;  %433 = vmatpush.msrb.mxu3 %v298_v8  ;;  %v582_v8 = vld [vmem:[%s1486_s5 + $0x10] sm:$0xff] }
  0x3a   :  { %597 = vmatpush.msrb.mxu1 %v594_v47 }
  0x3b   :  { %368 = vmatpush.msrb.mxu2 %v297_v7 }
  0x3c   :  { %878 = vmatmul.msk.f32.gmra.mxu2 %vm82_vm0, %v69_v57  ;;  %598 = vmatpush.msrb.mxu1 %v593_v48  ;;  %v589_v57 = vld [vmem:[%s1486_s5 + $0x48] sm:$0xff] }
  0x3e   :  { %854 = vmatmul.msk.f32.gmra.mxu0 %vm82_vm0, %v1117_v18  ;;  %863 = vmatmul.msk.f32.gmra.mxu3 %vm82_vm0, %v70_v63 }
  0x3f   :  { %599 = vmatpush.msrb.mxu1 %v592_v53 }
  0x40   :  { %869 = vmatmul.msk.f32.gmra.mxu1 %vm82_vm0, %v1106_v9  ;;  %v299_v9 = vld [vmem:[#allocation5 + $0x10] sm:$0xff] }
  0x41   :  { %498 = vmatpush.msrb.mxu0 %v299_v9  ;;  %600 = vmatpush.msrb.mxu1 %v591_v54  ;;  %v581_v9 = vld [vmem:[%s1486_s5 + $0x8] sm:$0xff] }
  0x43   :  { %601 = vmatpush.msrb.mxu1 %v590_v55 }
  0x44   :  { %879 = vmatmul.msk.f32.gmra.mxu2 %vm82_vm0, %v70_v63 }
  0x45   :  { %602 = vmatpush.msrb.mxu1 %v589_v57 }
  0x46   :  { %855 = vmatmul.msk.f32.gmra.mxu0 %vm82_vm0, %v1129_v32  ;;  %864 = vmatmul.msk.f32.gmra.mxu3 %vm82_vm0, %v71_v0 }
  0x47   :  { %603 = vmatpush.msrb.mxu1 %v588_v60 }
  0x48   :  { %870 = vmatmul.msk.f32.gmra.mxu1 %vm82_vm0, %v1117_v18 }
  0x49   :  { %604 = vmatpush.msrb.mxu1 %v587_v61 }
  0x4c   :  { %880 = vmatmul.msk.f32.gmra.mxu2 %vm82_vm0, %v71_v0  ;;  %v586_v0 = vld [vmem:[%s1486_s5 + $0x30] sm:$0xff] }
  0x4d   :  { %605 = vmatpush.msrb.mxu1 %v586_v0 }
  0x4e   :  { %856 = vmatmul.msk.f32.gmra.mxu0 %vm82_vm0, %v1143_v44 }
  0x4f   :  { %606 = vmatpush.msrb.mxu1 %v585_v1 }
  0x50   :  { %871 = vmatmul.msk.f32.gmra.mxu1 %vm82_vm0, %v1129_v32 }
  0x51   :  { %607 = vmatpush.msrb.mxu1 %v584_v3 }
  0x53   :  { %608 = vmatpush.msrb.mxu1 %v583_v5 }
  0x55   :  { %609 = vmatpush.msrb.mxu1 %v582_v8 }
  0x56   :  { %857 = vmatmul.msk.f32.gmra.mxu0 %vm82_vm0, %v64_v56 }
  0x57   :  { %610 = vmatpush.msrb.mxu1 %v581_v9 }
  0x58   :  { %872 = vmatmul.msk.f32.gmra.mxu1 %vm82_vm0, %v1143_v44 }
  0x60   :  { %873 = vmatmul.msk.f32.gmra.mxu1 %vm82_vm0, %v64_v56 }
  0x93   :  { %v148_v11 = vpop.f32.mrf.mxu0 }
  0x94   :  { %v265_v12 = vadd.f32 %v1190_v10, %v148_v11 }
  0x96   :  { %v281_v13 = vmax.f32 %v265_v12, 0.0  ;;  %v580_v12 = vld [vmem:[%s1486_s5] sm:$0xff] }
  0x97   :  { %611 = vmatpush.msrb.mxu1 %v580_v12 }
  0x98   :  { %369 = vmatmul.f32.vlgmr.msrb.gmra.mxu2 %v281_v13  ;;  %434 = vmatmul.f32.vlgmr.msrb.gmra.mxu3 %v281_v13 }
  0x99   :  { %499 = vmatmul.f32.vlgmr.msrb.gmra.mxu0 %v281_v13  ;;  %v175_v32 = vpop.f32.mrf.mxu3 }
  0x9a   :  { %v274_v41 = vadd.f32 %v1190_v10, %v175_v32 }
  0x9b   :  { %v151_v14 = vpop.f32.mrf.mxu0 }
  0x9c   :  { %v266_v15 = vadd.f32 %v1190_v10, %v151_v14  ;;  %v290_v42 = vmax.f32 %v274_v41, 0.0 }
  0x9e   :  { %v282_v16 = vmax.f32 %v266_v15, 0.0  ;;  %v1201_v39 = vpop.f32.mrf.mxu2 }
  0xa0   :  { %372 = vmatmul.f32.gmra.mxu2 %v282_v16  ;;  %437 = vmatmul.f32.gmra.mxu3 %v282_v16 }
  0xa1   :  { %502 = vmatmul.f32.gmra.mxu0 %v282_v16  ;;  %v178_v37 = vpop.f32.mrf.mxu3 }
  0xa2   :  { %v275_v45 = vadd.f32 %v1190_v10, %v178_v37 }
  0xa3   :  { %v154_v17 = vpop.f32.mrf.mxu0 }
  0xa4   :  { %v267_v18 = vadd.f32 %v1190_v10, %v154_v17  ;;  %v291_v49 = vmax.f32 %v275_v45, 0.0 }
  0xa6   :  { %v283_v19 = vmax.f32 %v267_v18, 0.0  ;;  %v213_v18 = vpop.f32.mrf.mxu1 }
  0xa7   :  { %v1204_v44 = vpop.f32.mrf.mxu2 }
  0xa8   :  { %375 = vmatmul.f32.gmra.mxu2 %v283_v19  ;;  %440 = vmatmul.f32.gmra.mxu3 %v283_v19 }
  0xa9   :  { %505 = vmatmul.f32.gmra.mxu0 %v283_v19  ;;  %v181_v43 = vpop.f32.mrf.mxu3  ;;  %v345_v19 = vld [vmem:[%s1485_s4] sm:$0x7]  ;;  %s1033_s4 = smov [#allocation7]  }
  0xaa   :  { %v276_v51 = vadd.f32 %v1190_v10, %v181_v43  ;;  %s836_s5 = sshll.u32 %s1033_s4, 4  ;;  %s837_s5 = int_to_ptr.vmem [resolvable:$true] %s836_s5 }
  0xab   :  { %v157_v20 = vpop.f32.mrf.mxu0 }
  0xac   :  { %v268_v21 = vadd.f32 %v1190_v10, %v157_v20  ;;  %v292_v56 = vmax.f32 %v276_v51, 0.0 }
  0xae   :  { %v284_v22 = vmax.f32 %v268_v21, 0.0  ;;  %v1273_v21 = vperm.slane %v345_v19, 2 }
  0xaf   :  { %v1217_v52 = vpop.f32.mrf.mxu2 }
  0xb0   :  { %378 = vmatmul.f32.gmra.mxu2 %v284_v22  ;;  %443 = vmatmul.f32.gmra.mxu3 %v284_v22 }
  0xb1   :  { %508 = vmatmul.f32.gmra.mxu0 %v284_v22  ;;  %v184_v50 = vpop.f32.mrf.mxu3 }
  0xb2   :  { %v277_v58 = vadd.f32 %v1190_v10, %v184_v50 }
  0xb3   :  { %v160_v23 = vpop.f32.mrf.mxu0 }
  0xb4   :  { %v269_v24 = vadd.f32 %v1190_v10, %v160_v23  ;;  %v293_v63 = vmax.f32 %v277_v58, 0.0  ;;  %v216_v23 = vpop.f32.mrf.mxu1 }
  0xb6   :  { %v285_v25 = vmax.f32 %v269_v24, 0.0 }
  0xb7   :  { %v1238_v62 = vpop.f32.mrf.mxu2 }
  0xb8   :  { %381 = vmatmul.f32.gmra.mxu2 %v285_v25  ;;  %446 = vmatmul.f32.gmra.mxu3 %v285_v25 }
  0xb9   :  { %511 = vmatmul.f32.gmra.mxu0 %v285_v25  ;;  %v187_v59 = vpop.f32.mrf.mxu3  ;;  %v1280_v25 = vperm.slane %v345_v19, 1 }
  0xba   :  { %v278_v2 = vadd.f32 %v1190_v10, %v187_v59 }
  0xbb   :  { %v163_v26 = vpop.f32.mrf.mxu0 }
  0xbc   :  { %v270_v27 = vadd.f32 %v1190_v10, %v163_v26  ;;  %v294_v6 = vmax.f32 %v278_v2, 0.0 }
  0xbe   :  { %v286_v28 = vmax.f32 %v270_v27, 0.0 }
  0xbf   :  { %v1253_v7 = vpop.f32.mrf.mxu2 }
  0xc0   :  { %384 = vmatmul.f32.gmra.mxu2 %v286_v28  ;;  %449 = vmatmul.f32.gmra.mxu3 %v286_v28 }
  0xc1   :  { %514 = vmatmul.f32.gmra.mxu0 %v286_v28  ;;  %v190_v4 = vpop.f32.mrf.mxu3 }
  0xc2   :  { %v279_v11 = vadd.f32 %v1190_v10, %v190_v4 }
  0xc3   :  { %v166_v29 = vpop.f32.mrf.mxu0 }
  0xc4   :  { %v271_v30 = vadd.f32 %v1190_v10, %v166_v29  ;;  %v295_v13 = vmax.f32 %v279_v11, 0.0 }
  0xc6   :  { %v287_v31 = vmax.f32 %v271_v30, 0.0 }
  0xc7   :  { %v1265_v15 = vpop.f32.mrf.mxu2 }
  0xc8   :  { %387 = vmatmul.f32.gmra.mxu2 %v287_v31  ;;  %452 = vmatmul.f32.gmra.mxu3 %v287_v31 }
  0xc9   :  { %517 = vmatmul.f32.gmra.mxu0 %v287_v31  ;;  %v193_v14 = vpop.f32.mrf.mxu3 }
  0xca   :  { %v280_v16 = vadd.f32 %v1190_v10, %v193_v14 }
  0xcb   :  { %v169_v33 = vpop.f32.mrf.mxu0 }
  0xcc   :  { %v272_v34 = vadd.f32 %v1190_v10, %v169_v33  ;;  %v296_v17 = vmax.f32 %v280_v16, 0.0 }
  0xce   :  { %v288_v35 = vmax.f32 %v272_v34, 0.0  ;;  %v219_v34 = vpop.f32.mrf.mxu1 }
  0xcf   :  { %v1271_v20 = vpop.f32.mrf.mxu2 }
  0xd0   :  { %390 = vmatmul.f32.gmra.mxu2 %v288_v35  ;;  %455 = vmatmul.f32.gmra.mxu3 %v288_v35 }
  0xd1   :  { %520 = vmatmul.f32.gmra.mxu0 %v288_v35 }
  0xd3   :  { %v172_v36 = vpop.f32.mrf.mxu0 }
  0xd4   :  { %v273_v38 = vadd.f32 %v1190_v10, %v172_v36  ;;  %v1278_v10 = vperm.slane %v345_v19, 0 }
  0xd6   :  { %v289_v40 = vmax.f32 %v273_v38, 0.0  ;;  %v222_v45 = vpop.f32.mrf.mxu1 }
  0xd8   :  { %393 = vmatmul.f32.gmra.mxu2 %v289_v40  ;;  %458 = vmatmul.f32.gmra.mxu3 %v289_v40 }
  0xd9   :  { %523 = vmatmul.f32.gmra.mxu0 %v289_v40 }
  0xde   :  { %v225_v59 = vpop.f32.mrf.mxu1 }
  0xe0   :  { %396 = vmatmul.f32.gmra.mxu2 %v290_v42  ;;  %461 = vmatmul.f32.gmra.mxu3 %v290_v42 }
  0xe1   :  { %526 = vmatmul.f32.gmra.mxu0 %v290_v42 }
  0xe6   :  { %v228_v8 = vpop.f32.mrf.mxu1 }
  0xe8   :  { %399 = vmatmul.f32.gmra.mxu2 %v291_v49  ;;  %464 = vmatmul.f32.gmra.mxu3 %v291_v49 }
  0xe9   :  { %529 = vmatmul.f32.gmra.mxu0 %v291_v49 }
  0xf0   :  { %402 = vmatmul.f32.gmra.mxu2 %v292_v56  ;;  %467 = vmatmul.f32.gmra.mxu3 %v292_v56 }
  0xf1   :  { %532 = vmatmul.f32.gmra.mxu0 %v292_v56 }
  0xf8   :  { %405 = vmatmul.f32.gmra.mxu2 %v293_v63  ;;  %470 = vmatmul.f32.gmra.mxu3 %v293_v63 }
  0xf9   :  { %535 = vmatmul.f32.gmra.mxu0 %v293_v63 }
 0x100   :  { %408 = vmatmul.f32.gmra.mxu2 %v294_v6  ;;  %473 = vmatmul.f32.gmra.mxu3 %v294_v6 }
 0x101   :  { %538 = vmatmul.f32.gmra.mxu0 %v294_v6 }
 0x108   :  { %411 = vmatmul.f32.gmra.mxu2 %v295_v13  ;;  %476 = vmatmul.f32.gmra.mxu3 %v295_v13 }
 0x109   :  { %541 = vmatmul.f32.gmra.mxu0 %v295_v13 }
 0x110   :  { %414 = vmatmul.f32.gmra.mxu2 %v296_v17  ;;  %479 = vmatmul.f32.gmra.mxu3 %v296_v17 }
 0x111   :  { %544 = vmatmul.f32.gmra.mxu0 %v296_v17 }
 0x116   :  { %v500_v22 = vpop.f32.mrf.mxu0 }
 0x117   :  { %v1276_v24 = vadd.f32 %v500_v22, %v1273_v21 }
 0x11b   :  { %v370_v26 = vpop.f32.mrf.mxu2  ;;  %v435_v27 = vpop.f32.mrf.mxu3 }
 0x11c   :  { %v371_v28 = vadd.f32 %v370_v26, %v1278_v10  ;;  %v1284_v29 = vadd.f32 %v435_v27, %v1280_v25 }
 0x11e   :  { %v548_v30 = vand.u32 2147483647, %v371_v28  ;;  %v503_v31 = vpop.f32.mrf.mxu0 }
 0x11f   :  { %v1287_v32 = vadd.f32 %v503_v31, %v1273_v21 }
 0x120   :  { %v564_v33 = vmul.f32 %v548_v30, %v213_v18 }
 0x122   :  { %612 = vmatmul.f32.vlgmr.msrb.gmra.mxu1 %v564_v33 }
 0x123   :  { %v373_v35 = vpop.f32.mrf.mxu2  ;;  %v438_v36 = vpop.f32.mrf.mxu3 }
 0x124   :  { %v374_v37 = vadd.f32 %v373_v35, %v1278_v10  ;;  %v1291_v38 = vadd.f32 %v438_v36, %v1280_v25 }
 0x126   :  { %v549_v40 = vand.u32 2147483647, %v374_v37  ;;  %v506_v41 = vpop.f32.mrf.mxu0 }
 0x127   :  { %v1294_v42 = vadd.f32 %v506_v41, %v1273_v21 }
 0x128   :  { %v565_v43 = vmul.f32 %v549_v40, %v216_v23  ;;  %v231_v23 = vpop.f32.mrf.mxu1 }
 0x12a   :  { %615 = vmatmul.f32.gmra.mxu1 %v565_v43 }
 0x12b   :  { %v376_v46 = vpop.f32.mrf.mxu2  ;;  %v441_v47 = vpop.f32.mrf.mxu3 }
 0x12c   :  { %v377_v48 = vadd.f32 %v376_v46, %v1278_v10  ;;  %v1298_v49 = vadd.f32 %v441_v47, %v1280_v25 }
 0x12e   :  { %v550_v50 = vand.u32 2147483647, %v377_v48  ;;  %v509_v51 = vpop.f32.mrf.mxu0 }
 0x12f   :  { %v1301_v53 = vadd.f32 %v509_v51, %v1273_v21 }
 0x130   :  { %v566_v54 = vmul.f32 %v550_v50, %v219_v34  ;;  %v234_v36 = vpop.f32.mrf.mxu1 }
 0x132   :  { %618 = vmatmul.f32.gmra.mxu1 %v566_v54 }
 0x133   :  { %v379_v55 = vpop.f32.mrf.mxu2  ;;  %v444_v56 = vpop.f32.mrf.mxu3 }
 0x134   :  { %v380_v57 = vadd.f32 %v379_v55, %v1278_v10  ;;  %v1305_v58 = vadd.f32 %v444_v56, %v1280_v25 }
 0x136   :  { %v551_v60 = vand.u32 2147483647, %v380_v57  ;;  %v512_v61 = vpop.f32.mrf.mxu0 }
 0x137   :  { %v1308_v63 = vadd.f32 %v512_v61, %v1273_v21 }
 0x138   :  { %v567_v0 = vmul.f32 %v551_v60, %v222_v45  ;;  %v237_v56 = vpop.f32.mrf.mxu1 }
 0x13a   :  { %621 = vmatmul.f32.gmra.mxu1 %v567_v0 }
 0x13b   :  { %v382_v1 = vpop.f32.mrf.mxu2  ;;  %v447_v2 = vpop.f32.mrf.mxu3 }
 0x13c   :  { %v383_v3 = vadd.f32 %v382_v1, %v1278_v10  ;;  %v1312_v4 = vadd.f32 %v447_v2, %v1280_v25 }
 0x13e   :  { %v552_v5 = vand.u32 2147483647, %v383_v3  ;;  %v515_v6 = vpop.f32.mrf.mxu0 }
 0x13f   :  { %v1315_v9 = vadd.f32 %v515_v6, %v1273_v21 }
 0x140   :  { %v568_v11 = vmul.f32 %v552_v5, %v225_v59 }
 0x142   :  { %624 = vmatmul.f32.gmra.mxu1 %v568_v11 }
 0x143   :  { %v385_v12 = vpop.f32.mrf.mxu2  ;;  %v450_v13 = vpop.f32.mrf.mxu3 }
 0x144   :  { %v386_v14 = vadd.f32 %v385_v12, %v1278_v10  ;;  %v1319_v16 = vadd.f32 %v450_v13, %v1280_v25 }
 0x146   :  { %v553_v17 = vand.u32 2147483647, %v386_v14  ;;  %v518_v18 = vpop.f32.mrf.mxu0 }
 0x147   :  { %v1322_v19 = vadd.f32 %v518_v18, %v1273_v21 }
 0x148   :  { %v569_v22 = vmul.f32 %v553_v17, %v228_v8 }
 0x14a   :  { %627 = vmatmul.f32.gmra.mxu1 %v569_v22 }
 0x14b   :  { %v388_v26 = vpop.f32.mrf.mxu2  ;;  %v453_v27 = vpop.f32.mrf.mxu3 }
 0x14c   :  { %v389_v28 = vadd.f32 %v388_v26, %v1278_v10  ;;  %v1326_v30 = vadd.f32 %v453_v27, %v1280_v25 }
 0x14e   :  { %v554_v31 = vand.u32 2147483647, %v389_v28  ;;  %v521_v33 = vpop.f32.mrf.mxu0 }
 0x14f   :  { %v1329_v34 = vadd.f32 %v521_v33, %v1273_v21 }
 0x150   :  { %v570_v35 = vmul.f32 %v554_v31, %v231_v23 }
 0x152   :  { %630 = vmatmul.f32.gmra.mxu1 %v570_v35 }
 0x153   :  { %v391_v37 = vpop.f32.mrf.mxu2  ;;  %v456_v40 = vpop.f32.mrf.mxu3 }
 0x154   :  { %v392_v41 = vadd.f32 %v391_v37, %v1278_v10  ;;  %v1333_v43 = vadd.f32 %v456_v40, %v1280_v25 }
 0x156   :  { %v555_v45 = vand.u32 2147483647, %v392_v41  ;;  %v524_v46 = vpop.f32.mrf.mxu0 }
 0x157   :  { %v1336_v47 = vadd.f32 %v524_v46, %v1273_v21 }
 0x158   :  { %v571_v48 = vmul.f32 %v555_v45, %v234_v36 }
 0x15a   :  { %633 = vmatmul.f32.gmra.mxu1 %v571_v48 }
 0x15b   :  { %v394_v50 = vpop.f32.mrf.mxu2  ;;  %v459_v51 = vpop.f32.mrf.mxu3 }
 0x15c   :  { %v395_v54 = vadd.f32 %v394_v50, %v1278_v10  ;;  %v1340_v55 = vadd.f32 %v459_v51, %v1280_v25 }
 0x15e   :  { %v556_v57 = vand.u32 2147483647, %v395_v54  ;;  %v527_v59 = vpop.f32.mrf.mxu0 }
 0x15f   :  { %v1343_v60 = vadd.f32 %v527_v59, %v1273_v21  ;;  %v760_v59 = vand.u32 2147483647, %v1276_v24 }
 0x160   :  { %v572_v61 = vmul.f32 %v556_v57, %v237_v56 }
 0x162   :  { %636 = vmatmul.f32.gmra.mxu1 %v572_v61 }
 0x163   :  { %v397_v0 = vpop.f32.mrf.mxu2  ;;  %v462_v1 = vpop.f32.mrf.mxu3 }
 0x164   :  { %v398_v2 = vadd.f32 %v397_v0, %v1278_v10  ;;  %v1347_v3 = vadd.f32 %v462_v1, %v1280_v25 }
 0x166   :  { %v557_v5 = vand.u32 2147483647, %v398_v2 }
 0x168   :  { %v573_v6 = vmul.f32 %v557_v5, %v1201_v39 }
 0x16a   :  { %639 = vmatmul.f32.gmra.mxu1 %v573_v6  ;;  %v761_v6 = vand.u32 2147483647, %v1287_v32 }
 0x16b   :  { %v400_v8 = vpop.f32.mrf.mxu2 }
 0x16c   :  { %v401_v11 = vadd.f32 %v400_v8, %v1278_v10 }
 0x16e   :  { %v558_v12 = vand.u32 2147483647, %v401_v11 }
 0x170   :  { %v574_v13 = vmul.f32 %v558_v12, %v1204_v44 }
 0x172   :  { %642 = vmatmul.f32.gmra.mxu1 %v574_v13 }
 0x173   :  { %v403_v14 = vpop.f32.mrf.mxu2 }
 0x174   :  { %v404_v17 = vadd.f32 %v403_v14, %v1278_v10 }
 0x176   :  { %v559_v18 = vand.u32 2147483647, %v404_v17 }
 0x178   :  { %v575_v22 = vmul.f32 %v559_v18, %v1217_v52 }
 0x17a   :  { %645 = vmatmul.f32.gmra.mxu1 %v575_v22  ;;  %v762_v22 = vand.u32 2147483647, %v1294_v42 }
 0x17b   :  { %v406_v23 = vpop.f32.mrf.mxu2 }
 0x17c   :  { %v407_v26 = vadd.f32 %v406_v23, %v1278_v10 }
 0x17e   :  { %v560_v27 = vand.u32 2147483647, %v407_v26 }
 0x180   :  { %v576_v39 = vmul.f32 %v560_v27, %v1238_v62 }
 0x182   :  { %648 = vmatmul.f32.gmra.mxu1 %v576_v39 }
 0x183   :  { %v409_v28 = vpop.f32.mrf.mxu2 }
 0x184   :  { %v410_v31 = vadd.f32 %v409_v28, %v1278_v10 }
 0x186   :  { %v561_v33 = vand.u32 2147483647, %v410_v31 }
 0x188   :  { %v577_v44 = vmul.f32 %v561_v33, %v1253_v7  ;;  %v757_v7 = vlaneseq }
 0x18a   :  { %651 = vmatmul.f32.gmra.mxu1 %v577_v44  ;;  %v1363_v56 = vand.u32 127, %v757_v7  ;;  %v763_v44 = vand.u32 2147483647, %v1301_v53 }
 0x18b   :  { %v412_v35 = vpop.f32.mrf.mxu2 }
 0x18c   :  { %v413_v36 = vadd.f32 %v412_v35, %v1278_v10  ;;  %vm759_vm1 = vcmp.lt.s32.totalorder %v1363_v56, 32  ;;  %v1032_v56 = vmov 1.0  }
 0x18d   :  { %v778_v1 = vsel %vm759_vm1, %v760_v59, %v1276_v24  ;;  %v779_v17 = vsel %vm759_vm1, %v761_v6, %v1287_v32  ;;  %v780_v31 = vsel %vm759_vm1, %v762_v22, %v1294_v42 }
 0x18e   :  { %v562_v37 = vand.u32 2147483647, %v413_v36 }
 0x190   :  { %v578_v52 = vmul.f32 %v562_v37, %v1265_v15 }
 0x192   :  { %654 = vmatmul.f32.gmra.mxu1 %v578_v52 }
 0x193   :  { %v415_v40 = vpop.f32.mrf.mxu2 }
 0x194   :  { %v416_v41 = vadd.f32 %v415_v40, %v1278_v10 }
 0x196   :  { %v563_v45 = vand.u32 2147483647, %v416_v41  ;;  %v781_v41 = vsel %vm759_vm1, %v763_v44, %v1301_v53 }
 0x198   :  { %v579_v62 = vmul.f32 %v563_v45, %v1271_v20 }
 0x19a   :  { %657 = vmatmul.f32.gmra.mxu1 %v579_v62  ;;  %v764_v62 = vand.u32 2147483647, %v1308_v63 }
 0x19f   :  { %v613_v46 = vpop.f32.mrf.mxu1 }
 0x1a0   :  { %v614_v48 = vadd.f32 %v613_v46, %v1284_v29 }
 0x1a2   :  { %v677_v50 = vmin.f32 %v614_v48, 0.0  ;;  %vm661_vm2 = vcmp.gt.f32.partialorder %v614_v48, 0.0 }
 0x1a4   :  { %v693_v51 = vmul.f32 1.442695, %v677_v50 }
 0x1a6   :  { %916 = vpow2.f32 %v693_v51 }
 0x1a7   :  { %v616_v54 = vpop.f32.mrf.mxu1 }
 0x1a8   :  { %v617_v15 = vadd.f32 %v616_v54, %v1291_v38  ;;  %v782_v54 = vsel %vm759_vm1, %v764_v62, %v1308_v63 }
 0x1aa   :  { %v678_v57 = vmin.f32 %v617_v15, 0.0  ;;  %vm662_vm3 = vcmp.gt.f32.partialorder %v617_v15, 0.0 }
 0x1ac   :  { %v917_v10 = vpop.eup %916  ;;  %v695_v20 = vmul.f32 1.442695, %v678_v57  ;;  %v765_v57 = vand.u32 2147483647, %v1315_v9 }
 0x1ad   :  { %v881_v61 = vadd.f32 -1.0, %v917_v10 }
 0x1ae   :  { %918 = vpow2.f32 %v695_v20 }
 0x1af   :  { %v619_v29 = vpop.f32.mrf.mxu1  ;;  %v741_v0 = vsel %vm661_vm2, %v614_v48, %v881_v61 }
 0x1b0   :  { %v620_v2 = vadd.f32 %v619_v29, %v1298_v49  ;;  %v1372_v5 = vmul.f32 %v778_v1, %v741_v0  ;;  %v783_v0 = vsel %vm759_vm1, %v765_v57, %v1315_v9 }
 0x1b2   :  { %v679_v38 = vmin.f32 %v620_v2, 0.0  ;;  %vm663_vm4 = vcmp.gt.f32.partialorder %v620_v2, 0.0 }
 0x1b4   :  { %v919_v8 = vpop.eup %918  ;;  %v697_v11 = vmul.f32 1.442695, %v679_v38 }
 0x1b5   :  { %v882_v12 = vadd.f32 -1.0, %v919_v8 }
 0x1b6   :  { %920 = vpow2.f32 %v697_v11 }
 0x1b7   :  { %v622_v13 = vpop.f32.mrf.mxu1  ;;  %v742_v14 = vsel %vm662_vm3, %v617_v15, %v882_v12 }
 0x1b8   :  { %v623_v24 = vadd.f32 %v622_v13, %v1305_v58  ;;  %v1379_v18 = vmul.f32 %v779_v17, %v742_v14 }
 0x1ba   :  { %v680_v49 = vmin.f32 %v623_v24, 0.0  ;;  %vm664_vm5 = vcmp.gt.f32.partialorder %v623_v24, 0.0 }
 0x1bc   :  { %v921_v23 = vpop.eup %920  ;;  %v699_v26 = vmul.f32 1.442695, %v680_v49 }
 0x1bd   :  { %v883_v27 = vadd.f32 -1.0, %v921_v23 }
 0x1be   :  { %922 = vpow2.f32 %v699_v26 }
 0x1bf   :  { %v625_v39 = vpop.f32.mrf.mxu1  ;;  %v743_v28 = vsel %vm663_vm4, %v620_v2, %v883_v27  ;;  %v766_v2 = vand.u32 2147483647, %v1322_v19 }
 0x1c0   :  { %v626_v32 = vadd.f32 %v625_v39, %v1312_v4  ;;  %v1386_v33 = vmul.f32 %v780_v31, %v743_v28  ;;  %v1425_v28 = vpop.f32.mrf.mxu0 }
 0x1c1   :  { %v784_v13 = vsel %vm759_vm1, %v766_v2, %v1322_v19 }
 0x1c2   :  { %v681_v58 = vmin.f32 %v626_v32, 0.0  ;;  %vm665_vm6 = vcmp.gt.f32.partialorder %v626_v32, 0.0 }
 0x1c4   :  { %v923_v35 = vpop.eup %922  ;;  %v701_v36 = vmul.f32 1.442695, %v681_v58 }
 0x1c5   :  { %v884_v37 = vadd.f32 -1.0, %v923_v35 }
 0x1c6   :  { %924 = vpow2.f32 %v701_v36 }
 0x1c7   :  { %v628_v52 = vpop.f32.mrf.mxu1  ;;  %v744_v40 = vsel %vm664_vm5, %v623_v24, %v884_v37  ;;  %v767_v24 = vand.u32 2147483647, %v1329_v34 }
 0x1c8   :  { %v629_v42 = vadd.f32 %v628_v52, %v1319_v16  ;;  %v1393_v45 = vmul.f32 %v781_v41, %v744_v40  ;;  %v769_v40 = vand.u32 2147483647, %v1343_v60 }
 0x1c9   :  { %v785_v19 = vsel %vm759_vm1, %v767_v24, %v1329_v34 }
 0x1ca   :  { %v682_v4 = vmin.f32 %v629_v42, 0.0  ;;  %vm666_vm7 = vcmp.gt.f32.partialorder %v629_v42, 0.0 }
 0x1cc   :  { %v925_v46 = vpop.eup %924  ;;  %v703_v48 = vmul.f32 1.442695, %v682_v4 }
 0x1cd   :  { %v885_v50 = vadd.f32 -1.0, %v925_v46 }
 0x1ce   :  { %926 = vpow2.f32 %v703_v48 }
 0x1cf   :  { %v631_v7 = vpop.f32.mrf.mxu1  ;;  %v745_v51 = vsel %vm665_vm6, %v626_v32, %v885_v50  ;;  %v768_v32 = vand.u32 2147483647, %v1336_v47  ;;  %v787_v50 = vsel %vm759_vm1, %v769_v40, %v1343_v60 }
 0x1d0   :  { %v632_v53 = vadd.f32 %v631_v7, %v1326_v30  ;;  %v1400_v15 = vmul.f32 %v782_v54, %v745_v51 }
 0x1d1   :  { %v786_v34 = vsel %vm759_vm1, %v768_v32, %v1336_v47 }
 0x1d2   :  { %v683_v16 = vmin.f32 %v632_v53, 0.0  ;;  %vm667_vm8 = vcmp.gt.f32.partialorder %v632_v53, 0.0 }
 0x1d4   :  { %v927_v59 = vpop.eup %926  ;;  %v705_v10 = vmul.f32 1.442695, %v683_v16 }
 0x1d5   :  { %v886_v20 = vadd.f32 -1.0, %v927_v59 }
 0x1d6   :  { %928 = vpow2.f32 %v705_v10 }
 0x1d7   :  { %v634_v61 = vpop.f32.mrf.mxu1  ;;  %v746_v29 = vsel %vm666_vm7, %v629_v42, %v886_v20  ;;  %v1434_v42 = vpop.f32.mrf.mxu0 }
 0x1d8   :  { %v635_v63 = vadd.f32 %v634_v61, %v1333_v43  ;;  %v1407_v1 = vmul.f32 %v783_v0, %v746_v29  ;;  %v1416_v43 = vpop.f32.mrf.mxu3 }
 0x1da   :  { %v684_v30 = vmin.f32 %v635_v63, 0.0  ;;  %vm668_vm9 = vcmp.gt.f32.partialorder %v635_v63, 0.0 }
 0x1dc   :  { %v929_v38 = vpop.eup %928  ;;  %v707_v6 = vmul.f32 1.442695, %v684_v30 }
 0x1dd   :  { %v887_v8 = vadd.f32 -1.0, %v929_v38 }
 0x1de   :  { %930 = vpow2.f32 %v707_v6 }
 0x1df   :  { %v637_v11 = vpop.f32.mrf.mxu1  ;;  %v747_v12 = vsel %vm667_vm8, %v632_v53, %v887_v8  ;;  %v536_v51 = vpop.f32.mrf.mxu0 }
 0x1e0   :  { %v638_v9 = vadd.f32 %v637_v11, %v1340_v55  ;;  %v1414_v14 = vmul.f32 %v784_v13, %v747_v12  ;;  %v468_v58 = vpop.f32.mrf.mxu3 }
 0x1e1   :  { %v469_v13 = vadd.f32 %v468_v58, %v1280_v25 }
 0x1e2   :  { %v685_v17 = vmin.f32 %v638_v9, 0.0  ;;  %vm669_vm10 = vcmp.gt.f32.partialorder %v638_v9, 0.0 }
 0x1e4   :  { %v931_v49 = vpop.eup %930  ;;  %v709_v22 = vmul.f32 1.442695, %v685_v17 }
 0x1e5   :  { %v888_v23 = vadd.f32 -1.0, %v931_v49 }
 0x1e6   :  { %932 = vpow2.f32 %v709_v22 }
 0x1e7   :  { %v640_v26 = vpop.f32.mrf.mxu1  ;;  %v748_v27 = vsel %vm668_vm9, %v635_v63, %v888_v23  ;;  %v539_v16 = vpop.f32.mrf.mxu0 }
 0x1e8   :  { %v641_v55 = vadd.f32 %v640_v26, %v1347_v3  ;;  %v1423_v39 = vmul.f32 %v785_v19, %v748_v27  ;;  %v471_v4 = vpop.f32.mrf.mxu3  ;;  %v466_v26 = vadd.f32 %v1416_v43, %v1280_v25 }
 0x1e9   :  { %v472_v60 = vadd.f32 %v471_v4, %v1280_v25 }
 0x1ea   :  { %v686_v31 = vmin.f32 %v641_v55, 0.0  ;;  %vm670_vm11 = vcmp.gt.f32.partialorder %v641_v55, 0.0 }
 0x1ec   :  { %v933_v44 = vpop.eup %932  ;;  %v711_v35 = vmul.f32 1.442695, %v686_v31 }
 0x1ed   :  { %v889_v36 = vadd.f32 -1.0, %v933_v44 }
 0x1ee   :  { %934 = vpow2.f32 %v711_v35 }
 0x1ef   :  { %v643_v37 = vpop.f32.mrf.mxu1  ;;  %v749_v52 = vsel %vm669_vm10, %v638_v9, %v889_v36  ;;  %v542_v29 = vpop.f32.mrf.mxu0 }
 0x1f0   :  { %v1431_v3 = vmul.f32 %v786_v34, %v749_v52  ;;  %v474_v47 = vpop.f32.mrf.mxu3  ;;  %v644_v19 = vadd.f32 %v643_v37, %v466_v26  ;;  %v543_v58 = vadd.f32 %v542_v29, %v1273_v21  ;;  %v534_v29 = vadd.f32 %v1434_v42, %v1273_v21 }
 0x1f1   :  { %v475_v61 = vadd.f32 %v474_v47, %v1280_v25 }
 0x1f2   :  { %v687_v36 = vmin.f32 %v644_v19, 0.0  ;;  %v774_v43 = vand.u32 2147483647, %v543_v58  ;;  %vm671_vm2 = vcmp.gt.f32.partialorder %v644_v19, 0.0 }
 0x1f4   :  { %v935_v41 = vpop.eup %934 }
 0x1f5   :  { %v890_v62 = vadd.f32 -1.0, %v935_v41 }
 0x1f7   :  { %v646_v46 = vpop.f32.mrf.mxu1  ;;  %v750_v48 = vsel %vm670_vm11, %v641_v55, %v890_v62  ;;  %v545_v24 = vpop.f32.mrf.mxu0  ;;  %v713_v62 = vmul.f32 1.442695, %v687_v36 }
 0x1f8   :  { %v1439_v7 = vmul.f32 %v787_v50, %v750_v48  ;;  %v477_v57 = vpop.f32.mrf.mxu3  ;;  %v647_v17 = vadd.f32 %v646_v46, %v469_v13  ;;  %v546_v27 = vadd.f32 %v545_v24, %v1273_v21 }
 0x1f9   :  { %v478_v59 = vadd.f32 %v477_v57, %v1280_v25  ;;  %v792_v57 = vsel %vm759_vm1, %v774_v43, %v543_v58 }
 0x1fa   :  { %v688_v55 = vmin.f32 %v647_v17, 0.0  ;;  %v775_v44 = vand.u32 2147483647, %v546_v27  ;;  %vm672_vm0 = vcmp.gt.f32.partialorder %v647_v17, 0.0 }
 0x1fc   :  { %v715_v52 = vmul.f32 1.442695, %v688_v55  ;;  %v793_v37 = vsel %vm759_vm1, %v775_v44, %v546_v27 }
 0x1ff   :  { %v649_v54 = vpop.f32.mrf.mxu1 }
 0x200   :  { %v480_v0 = vpop.f32.mrf.mxu3  ;;  %v650_v6 = vadd.f32 %v649_v54, %v472_v60  ;;  %v537_v54 = vadd.f32 %v536_v51, %v1273_v21 }
 0x201   :  { %v481_v2 = vadd.f32 %v480_v0, %v1280_v25  ;;  %v540_v25 = vadd.f32 %v539_v16, %v1273_v21 }
 0x202   :  { %v689_v49 = vmin.f32 %v650_v6, 0.0  ;;  %v772_v0 = vand.u32 2147483647, %v537_v54  ;;  %vm673_vm15 = vcmp.gt.f32.partialorder %v650_v6, 0.0 }
 0x204   :  { %v717_v31 = vmul.f32 1.442695, %v689_v49 }
 0x207   :  { %v652_v53 = vpop.f32.mrf.mxu1 }
 0x208   :  { %v653_v63 = vadd.f32 %v652_v53, %v475_v61  ;;  %v773_v53 = vand.u32 2147483647, %v540_v25 }
 0x20a   :  { %v690_v8 = vmin.f32 %v653_v63, 0.0  ;;  %vm674_vm14 = vcmp.gt.f32.partialorder %v653_v63, 0.0 }
 0x20c   :  { %v719_v22 = vmul.f32 1.442695, %v690_v8  ;;  %v771_v8 = vand.u32 2147483647, %v534_v29 }
 0x20f   :  { %v655_v10 = vpop.f32.mrf.mxu1 }
 0x210   :  { %v656_v20 = vadd.f32 %v655_v10, %v478_v59 }
 0x212   :  { %v691_v30 = vmin.f32 %v656_v20, 0.0  ;;  %vm675_vm13 = vcmp.gt.f32.partialorder %v656_v20, 0.0 }
 0x214   :  { %v721_v11 = vmul.f32 1.442695, %v691_v30 }
 0x216   :  { %936 = vpow2.f32 %v721_v11 }
 0x217   :  { %v658_v38 = vpop.f32.mrf.mxu1 }
 0x218   :  { %v659_v12 = vadd.f32 %v658_v38, %v481_v2  ;;  %v531_v38 = vadd.f32 %v1425_v28, %v1273_v21 }
 0x21a   :  { %v692_v9 = vmin.f32 %v659_v12, 0.0  ;;  %vm676_vm12 = vcmp.gt.f32.partialorder %v659_v12, 0.0  ;;  %v770_v13 = vand.u32 2147483647, %v531_v38 }
 0x21c   :  { %v723_v23 = vmul.f32 1.442695, %v692_v9  ;;  %v937_v32 = vpop.eup %936  ;;  %v789_v9 = vsel %vm759_vm1, %v771_v8, %v534_v29  ;;  %v788_v21 = vsel %vm759_vm1, %v770_v13, %v531_v38 }
 0x21d   :  { %v895_v34 = vadd.f32 -1.0, %v937_v32 }
 0x21e   :  { %938 = vpow2.f32 %v723_v23 }
 0x21f   :  { %940 = vpow2.f32 %v719_v22  ;;  %v755_v50 = vsel %vm675_vm13, %v656_v20, %v895_v34  ;;  %v791_v20 = vsel %vm759_vm1, %v773_v53, %v540_v25 }
 0x220   :  { %942 = vpow2.f32 %v717_v31  ;;  %v808_v16 = vmul.f32 %v792_v57, %v755_v50 }
 0x221   :  { %944 = vpow2.f32 %v715_v52 }
 0x222   :  { %946 = vpow2.f32 %v713_v62 }
 0x224   :  { %v939_v35 = vpop.eup %938 }
 0x225   :  { %v896_v40 = vadd.f32 -1.0, %v939_v35  ;;  %v941_v41 = vpop.eup %940 }
 0x226   :  { %v894_v48 = vadd.f32 -1.0, %v941_v41  ;;  %v943_v47 = vpop.eup %942 }
 0x227   :  { %v756_v4 = vsel %vm676_vm12, %v659_v12, %v896_v40  ;;  %v893_v59 = vadd.f32 -1.0, %v943_v47  ;;  %v945_v61 = vpop.eup %944 }
 0x228   :  { %v809_v46 = vmul.f32 %v793_v37, %v756_v4  ;;  %v754_v10 = vsel %vm674_vm14, %v653_v63, %v894_v48  ;;  %v892_v30 = vadd.f32 -1.0, %v945_v61  ;;  %v947_v2 = vpop.eup %946  ;;  %v790_v63 = vsel %vm759_vm1, %v772_v0, %v537_v54 }
 0x229   :  { %v807_v51 = vmul.f32 %v791_v20, %v754_v10  ;;  %v753_v60 = vsel %vm673_vm15, %v650_v6, %v893_v59  ;;  %v891_v42 = vadd.f32 -1.0, %v947_v2 }
 0x22a   :  { %810 = vmatpush.xpose.msra.mxu2 %v809_v46  ;;  %v806_v11 = vmul.f32 %v790_v63, %v753_v60  ;;  %v752_v12 = vsel %vm672_vm0, %v647_v17, %v892_v30 }
 0x22b   :  { %v805_v6 = vmul.f32 %v789_v9, %v752_v12  ;;  %v751_v24 = vsel %vm671_vm2, %v644_v19, %v891_v42 }
 0x22c   :  { %v804_v28 = vmul.f32 %v788_v21, %v751_v24 }
 0x22e   :  { %811 = vmatpush.xpose.msra.mxu2 %v808_v16 }
 0x232   :  { %812 = vmatpush.xpose.msra.mxu2 %v807_v51 }
 0x236   :  { %813 = vmatpush.xpose.msra.mxu2 %v806_v11 }
 0x23a   :  { %814 = vmatpush.xpose.msra.mxu2 %v805_v6 }
 0x23e   :  { %815 = vmatpush.xpose.msra.mxu2 %v804_v28 }
 0x242   :  { %816 = vmatpush.xpose.msra.mxu2 %v1439_v7 }
 0x246   :  { %817 = vmatpush.xpose.msra.mxu2 %v1431_v3 }
 0x24a   :  { %818 = vmatpush.xpose.msra.mxu2 %v1423_v39 }
 0x24e   :  { %819 = vmatpush.xpose.msra.mxu2 %v1414_v14 }
 0x252   :  { %820 = vmatpush.xpose.msra.mxu2 %v1407_v1 }
 0x256   :  { %821 = vmatpush.xpose.msra.mxu2 %v1400_v15 }
 0x25a   :  { %822 = vmatpush.xpose.msra.mxu2 %v1393_v45 }
 0x25e   :  { %823 = vmatpush.xpose.msra.mxu2 %v1386_v33 }
 0x262   :  { %824 = vmatpush.xpose.msra.mxu2 %v1379_v18 }
 0x266   :  { %825 = vmatpush.xpose.msra.mxu2 %v1372_v5 }
 0x269   :  { %826 = vmatmul.f32.vlgmr.msra.gmra.mxu2 %v1032_v56 }
 0x2ec   :  { %v827_v1 = vpop.f32.mrf.mxu2 }
 0x2ed   :  { %830 = vst [vmem:[#allocation7] sm:$0x1] %v827_v1 }
 0x2ee   :  { %841 = dma.vmem_to_hbm [thread:$0]  %s837_s5, 16, %s839_s23, [#allocation4]  }
 0x2ef   :  { %1024 = dma.done.wait [#allocation4], 16  }
 0x2f0   :  { %1025 = vsyncadd [#allocation4], 4294967280 }
 0x2f1   :  { %846 = vsyncpa [#allocation3], 1 }
 0x2f2   :  { %847 = vsyncpa [#allocation6], 1 }
 0x2f3   :  { %848 = vsyncpa [#allocation4], 1 }

</bundles_post_ra>
